<compile_context>
chip_gen: v5e
topology: v5e:2x2
jax: 0.10.0
libtpu: 0.0.40
codegen_flags: <defaults>
</compile_context>

<pallas_src>
import jax
import jax.numpy as jnp
from jax.experimental import pallas as pl
from jax.experimental.pallas import tpu as pltpu

EPS = 1e-5
HALO = 8  # sublane-aligned halo above/below the (N*H) row axis (keeps center tap aligned)


def _make_kernel(N, H, W, Cin, Cout):
    NH = N * H
    NHW = N * H * W
    WCI = W * Cin
    WCO = W * Cout

    def kernel(x_ref, w1_ref, w2_ref, ws_ref, g1_ref, b1_ref, g2_ref, b2_ref,
               gs_ref, bs_ref, gmat_ref, gmt_ref, o_ref, pad_ref):
        # hoisted halo/seam masks: row -> h inside its image (reused by both convs)
        hh = jax.lax.broadcasted_iota(jnp.int32, (NH, 1), 0) % H
        valid_up = hh >= 1            # tap dh = -1 stays inside the image
        valid_dn = hh < (H - 1)       # tap dh = +1 stays inside the image
        inv_nhw = 1.0 / float(NHW)

        def bn(acc, gamma_ref, beta_ref):
            # single-pass training-mode BatchNorm2d (biased var, clamped >= 0),
            # folded per-lane scale/shift; channel stats gathered / re-broadcast
            # across interleaved lanes with the precomputed factored matrices.
            s1 = jnp.sum(acc, axis=0, keepdims=True)              # (1, WCO)
            s2 = jnp.sum(acc * acc, axis=0, keepdims=True)        # (1, WCO)
            mean = jnp.dot(jnp.dot(s1, gmat_ref[...],
                                   preferred_element_type=jnp.float32) * inv_nhw,
                           gmt_ref[...], preferred_element_type=jnp.float32)
            ex2 = jnp.dot(jnp.dot(s2, gmat_ref[...],
                                  preferred_element_type=jnp.float32) * inv_nhw,
                          gmt_ref[...], preferred_element_type=jnp.float32)
            var = jnp.maximum(ex2 - mean * mean, 0.0)
            scale = gamma_ref[...] * jax.lax.rsqrt(var + EPS)     # (1, WCO)
            shift = beta_ref[...] - mean * scale
            return acc * scale + shift

        def conv3x3(width, w_ref):
            # 3 accumulated per-tap MXU matmuls over sublane-shifted slices of the
            # row-halo scratch; the W taps + channel mixing are folded into the
            # banded weight.  Halo / image-seam rows are nullified in-vreg
            # (select), so no scratch zeroing is needed.  bf16 MXU operands.
            c = pad_ref[HALO:HALO + NH, 0:width].astype(jnp.bfloat16)
            u = jnp.where(valid_up, pad_ref[HALO - 1:HALO - 1 + NH, 0:width],
                          0.0).astype(jnp.bfloat16)
            d = jnp.where(valid_dn, pad_ref[HALO + 1:HALO + 1 + NH, 0:width],
                          0.0).astype(jnp.bfloat16)
            acc = jnp.dot(u, w_ref[0:width, :], preferred_element_type=jnp.float32)
            acc = acc + jnp.dot(c, w_ref[width:2 * width, :],
                                preferred_element_type=jnp.float32)
            acc = acc + jnp.dot(d, w_ref[2 * width:3 * width, :],
                                preferred_element_type=jnp.float32)
            return acc                                            # (NH, WCO) f32

        x = x_ref[...]                                            # (NH, WCI) f32

        # ---- stage 1: conv3x3 -> BN -> ReLU (intermediate never leaves VMEM) ----
        # NOTE: 64-lane store is sub-128 (masked vst); negligible at this scale.
        pad_ref[HALO:HALO + NH, 0:WCI] = x
        out1 = jnp.maximum(bn(conv3x3(WCI, w1_ref), g1_ref, b1_ref), 0.0)

        # ---- stage 2: conv3x3 -> BN ; 1x1-conv shortcut -> BN ; add ; ReLU ----
        pad_ref[HALO:HALO + NH, :] = out1
        main = bn(conv3x3(WCO, w2_ref), g2_ref, b2_ref)
        sc = bn(jnp.dot(x.astype(jnp.bfloat16), ws_ref[...],
                        preferred_element_type=jnp.float32), gs_ref, bs_ref)
        o_ref[...] = jnp.maximum(main + sc, 0.0)   # dense, unmasked (NH, WCO) store

    return kernel


def _band3x3(w_hwio, W):
    """HWIO (3,3,Ci,Co) conv weight -> (3*W*Ci, W*Co) per-tap banded matmul weight.

    Tap block kh occupies rows [kh*W*Ci, (kh+1)*W*Ci); within it, row wp*Ci + c,
    col w*Co + d holds w[kh, kw, c, d] with wp == w + (kw-1).  W-direction zero
    padding is implicit (out-of-range diagonals are simply absent)."""
    KH, KW, Ci, Co = w_hwio.shape
    blocks = []
    for kh in range(KH):
        m = jnp.zeros((W * Ci, W * Co), jnp.float32)
        for kw in range(KW):
            m = m + jnp.kron(jnp.eye(W, k=-(kw - 1), dtype=jnp.float32),
                             w_hwio[kh, kw].astype(jnp.float32))
        blocks.append(m)
    return jnp.concatenate(blocks, axis=0)


def basic_block(x, params):
    """x: (N, H, W, Cin) float32 (NHWC) -> (N, H, W, Cout) float32."""
    N, H, W, Cin = x.shape
    Cout = params['w1'].shape[-1]
    NH, WCI, WCO = N * H, W * Cin, W * Cout

    # one-time layout plumbing (tiny): banded bf16 conv weights, per-lane BN
    # params, factored BN channel-gather matrices
    w1b = _band3x3(params['w1'], W).astype(jnp.bfloat16)          # (3*WCI, WCO)
    w2b = _band3x3(params['w2'], W).astype(jnp.bfloat16)          # (3*WCO, WCO)
    wsb = jnp.kron(jnp.eye(W, dtype=jnp.float32),
                   params['ws'].astype(jnp.float32)).astype(jnp.bfloat16)  # (WCI, WCO)

    def lane(v):                                                  # (Cout,) -> (1, W*Cout)
        return jnp.tile(v.astype(jnp.float32).reshape(-1), W).reshape(1, WCO)

    g1l, b1l = lane(params['g1']), lane(params['b1'])
    g2l, b2l = lane(params['g2']), lane(params['b2'])
    gsl, bsl = lane(params['gs']), lane(params['bs'])

    lane_c = jnp.arange(WCO, dtype=jnp.int32) % Cout
    gmat = (lane_c[:, None] == jnp.arange(Cout, dtype=jnp.int32)[None, :]
            ).astype(jnp.float32)                                 # (WCO, Cout) gather
    gmt = gmat.T                                                  # (Cout, WCO) re-broadcast

    x2 = x.reshape(NH, WCI)        # free bitcast: NHWC -> lane-dense (N*H, W*Cin)

    vmem = pl.BlockSpec(memory_space=pltpu.MemorySpace.VMEM)
    flops = (3 * 2 * NH * WCI * WCO          # conv1: 3 taps
             + 3 * 2 * NH * WCO * WCO        # conv2: 3 taps
             + 2 * NH * WCI * WCO            # 1x1 shortcut
             + 3 * 4 * WCO * Cout)           # BN stat gathers
    bytes_accessed = (4 * NH * WCI + 4 * NH * WCO
                      + 2 * (3 * WCI * WCO + 3 * WCO * WCO + WCI * WCO)
                      + 4 * (6 * WCO + 2 * WCO * Cout))

    out2 = pl.pallas_call(
        _make_kernel(N, H, W, Cin, Cout),
        out_shape=jax.ShapeDtypeStruct((NH, WCO), jnp.float32),
        in_specs=[vmem] * 12,
        out_specs=vmem,
        scratch_shapes=[
            pltpu.VMEM((HALO + NH + HALO, WCO), jnp.float32),     # row-halo activations
        ],
        cost_estimate=pl.CostEstimate(flops=flops, transcendentals=3 * WCO,
                                      bytes_accessed=bytes_accessed),
    )(x2, w1b, w2b, wsb, g1l, b1l, g2l, b2l, gsl, bsl, gmat, gmt)

    return out2.reshape(N, H, W, Cout)                            # free bitcast back


def reference(x, p):
    """Pure-JAX f32 reference matching the PyTorch forward (training-mode BN)."""
    def conv(a, w):
        return jax.lax.conv_general_dilated(
            a, w, (1, 1), 'SAME', dimension_numbers=('NHWC', 'HWIO', 'NHWC'))

    def bn(a, g, b):
        mean = jnp.mean(a, axis=(0, 1, 2), keepdims=True)
        var = jnp.mean((a - mean) ** 2, axis=(0, 1, 2), keepdims=True)
        return (a - mean) * jax.lax.rsqrt(var + EPS) * g.reshape(1, 1, 1, -1) \
            + b.reshape(1, 1, 1, -1)

    cin, cout = p['ws'].shape
    out = jax.nn.relu(bn(conv(x, p['w1']), p['g1'], p['b1']))
    out = bn(conv(out, p['w2']), p['g2'], p['b2'])
    sc = bn(conv(x, p['ws'].reshape(1, 1, cin, cout)), p['gs'], p['bs'])
    return jax.nn.relu(out + sc)


if __name__ == "__main__":
    N, H, W, Cin, Cout = 2, 16, 16, 4, 8          # in_planes=4, planes=8, stride=1
    key = jax.random.PRNGKey(0)
    ks = jax.random.split(key, 10)

    x = jax.random.normal(ks[0], (N, H, W, Cin), jnp.float32)
    params = dict(
        w1=jax.random.normal(ks[1], (3, 3, Cin, Cout), jnp.float32) * 0.1,
        g1=1.0 + 0.1 * jax.random.normal(ks[2], (Cout,), jnp.float32),
        b1=0.1 * jax.random.normal(ks[3], (Cout,), jnp.float32),
        w2=jax.random.normal(ks[4], (3, 3, Cout, Cout), jnp.float32) * 0.1,
        g2=1.0 + 0.1 * jax.random.normal(ks[5], (Cout,), jnp.float32),
        b2=0.1 * jax.random.normal(ks[6], (Cout,), jnp.float32),
        ws=jax.random.normal(ks[7], (Cin, Cout), jnp.float32) * 0.1,
        gs=1.0 + 0.1 * jax.random.normal(ks[8], (Cout,), jnp.float32),
        bs=0.1 * jax.random.normal(ks[9], (Cout,), jnp.float32),
    )

    out = jax.block_until_ready(basic_block(x, params))
    ref = reference(x, params)
    assert out.shape == (N, H, W, Cout)
    err = jnp.max(jnp.abs(out - ref))
    # bf16 MXU operands (f32 accumulation) vs f32 reference -> mixed-precision tolerance
    assert jnp.allclose(out, ref, atol=3e-2, rtol=3e-2), f"max err {err}"
    print("KERNEL_OK")
</pallas_src>

<mosaic_0001>
module attributes {stable_mosaic.version = 11 : i64} {
  func.func @kernel(%arg0: memref<32x64xf32, #tpu.memory_space<vmem>>, %arg1: memref<192x128xbf16, #tpu.memory_space<vmem>>, %arg2: memref<384x128xbf16, #tpu.memory_space<vmem>>, %arg3: memref<64x128xbf16, #tpu.memory_space<vmem>>, %arg4: memref<1x128xf32, #tpu.memory_space<vmem>>, %arg5: memref<1x128xf32, #tpu.memory_space<vmem>>, %arg6: memref<1x128xf32, #tpu.memory_space<vmem>>, %arg7: memref<1x128xf32, #tpu.memory_space<vmem>>, %arg8: memref<1x128xf32, #tpu.memory_space<vmem>>, %arg9: memref<1x128xf32, #tpu.memory_space<vmem>>, %arg10: memref<128x8xf32, #tpu.memory_space<vmem>>, %arg11: memref<8x128xf32, #tpu.memory_space<vmem>>, %arg12: memref<32x128xf32, #tpu.memory_space<vmem>>, %arg13: memref<48x128xf32, #tpu.memory_space<vmem>>) attributes {dimension_semantics = [], scalar_prefetch = 0 : i64, scratch_operands = 1 : i64, tpu.core_type = #tpu.core_type<tc>} {
    %0 = tpu.iota {dimensions = array<i32: 0>} : vector<32x1xi32>
    %c16_i32 = arith.constant 16 : i32
    %c0_i32 = arith.constant 0 : i32
    %1 = arith.cmpi eq, %c16_i32, %c0_i32 : i32
    %c1_i32 = arith.constant 1 : i32
    %2 = arith.select %1, %c1_i32, %c16_i32 : i32
    %3 = vector.broadcast %2 : i32 to vector<32x1xi32>
    %4 = arith.remsi %0, %3 : vector<32x1xi32>
    %c0_i32_0 = arith.constant 0 : i32
    %5 = vector.broadcast %c0_i32_0 : i32 to vector<32x1xi32>
    %6 = arith.cmpi ne, %4, %5 : vector<32x1xi32>
    %c0_i32_1 = arith.constant 0 : i32
    %7 = vector.broadcast %c0_i32_1 : i32 to vector<32x1xi32>
    %8 = arith.cmpi slt, %4, %7 : vector<32x1xi32>
    %c0_i32_2 = arith.constant 0 : i32
    %9 = arith.cmpi slt, %2, %c0_i32_2 : i32
    %10 = vector.broadcast %9 : i1 to vector<32x1xi1>
    %11 = vector.broadcast %10 : vector<32x1xi1> to vector<32x1xi1>
    %12 = arith.xori %8, %11 : vector<32x1xi1>
    %13 = arith.andi %12, %6 : vector<32x1xi1>
    %14 = vector.broadcast %2 : i32 to vector<32x1xi32>
    %15 = arith.addi %4, %14 : vector<32x1xi32>
    %16 = arith.select %13, %15, %4 : vector<32x1xi1>, vector<32x1xi32>
    %c1_i32_3 = arith.constant 1 : i32
    %17 = vector.broadcast %c1_i32_3 : i32 to vector<32x1xi32>
    %18 = arith.cmpi sge, %16, %17 : vector<32x1xi32>
    %c15_i32 = arith.constant 15 : i32
    %19 = vector.broadcast %c15_i32 : i32 to vector<32x1xi32>
    %20 = arith.cmpi slt, %16, %19 : vector<32x1xi32>
    %c0 = arith.constant 0 : index
    %c0_4 = arith.constant 0 : index
    %21 = vector.load %arg0[%c0, %c0_4] : memref<32x64xf32, #tpu.memory_space<vmem>>, vector<32x64xf32>
    %c8 = arith.constant 8 : index
    %c0_5 = arith.constant 0 : index
    %22 = vector.load %arg13[%c8, %c0_5] : memref<48x128xf32, #tpu.memory_space<vmem>>, vector<32x64xf32>
    tpu.vector_store %arg13[%c8, %c0_5], %21 {strides = array<i32>} : memref<48x128xf32, #tpu.memory_space<vmem>>, vector<32x64xf32>,
    %c8_6 = arith.constant 8 : index
    %c0_7 = arith.constant 0 : index
    %23 = vector.load %arg13[%c8_6, %c0_7] : memref<48x128xf32, #tpu.memory_space<vmem>>, vector<32x64xf32>
    %24 = arith.truncf %23 : vector<32x64xf32> to vector<32x64xbf16>
    %c7 = arith.constant 7 : index
    %c0_8 = arith.constant 0 : index
    %25 = vector.load %arg13[%c7, %c0_8] : memref<48x128xf32, #tpu.memory_space<vmem>>, vector<32x64xf32>
    %cst = arith.constant 0.000000e+00 : f32
    %26 = vector.shape_cast %18 : vector<32x1xi1> to vector<32x1xi1>
    %27 = vector.broadcast %26 : vector<32x1xi1> to vector<32x64xi1>
    %28 = vector.broadcast %cst : f32 to vector<32x64xf32>
    %29 = arith.select %27, %25, %28 : vector<32x64xi1>, vector<32x64xf32>
    %30 = arith.truncf %29 : vector<32x64xf32> to vector<32x64xbf16>
    %c9 = arith.constant 9 : index
    %c0_9 = arith.constant 0 : index
    %31 = vector.load %arg13[%c9, %c0_9] : memref<48x128xf32, #tpu.memory_space<vmem>>, vector<32x64xf32>
    %cst_10 = arith.constant 0.000000e+00 : f32
    %32 = vector.shape_cast %20 : vector<32x1xi1> to vector<32x1xi1>
    %33 = vector.broadcast %32 : vector<32x1xi1> to vector<32x64xi1>
    %34 = vector.broadcast %cst_10 : f32 to vector<32x64xf32>
    %35 = arith.select %33, %31, %34 : vector<32x64xi1>, vector<32x64xf32>
    %36 = arith.truncf %35 : vector<32x64xf32> to vector<32x64xbf16>
    %c0_11 = arith.constant 0 : index
    %c0_12 = arith.constant 0 : index
    %37 = vector.load %arg1[%c0_11, %c0_12] : memref<192x128xbf16, #tpu.memory_space<vmem>>, vector<64x128xbf16>
    %cst_13 = arith.constant dense<0.000000e+00> : vector<32x128xf32>
    %38 = tpu.matmul %30, %37, %cst_13 {dimension_numbers = #tpu.dot_dimension_numbers<[1], [0], [0], [1], [0, 0, 1, 1], [], []>} : vector<32x64xbf16>, vector<64x128xbf16>, vector<32x128xf32> -> vector<32x128xf32>
    %c64 = arith.constant 64 : index
    %c0_14 = arith.constant 0 : index
    %39 = vector.load %arg1[%c64, %c0_14] : memref<192x128xbf16, #tpu.memory_space<vmem>>, vector<64x128xbf16>
    %cst_15 = arith.constant dense<0.000000e+00> : vector<32x128xf32>
    %40 = tpu.matmul %24, %39, %cst_15 {dimension_numbers = #tpu.dot_dimension_numbers<[1], [0], [0], [1], [0, 0, 1, 1], [], []>} : vector<32x64xbf16>, vector<64x128xbf16>, vector<32x128xf32> -> vector<32x128xf32>
    %41 = arith.addf %38, %40 : vector<32x128xf32>
    %c128 = arith.constant 128 : index
    %c0_16 = arith.constant 0 : index
    %42 = vector.load %arg1[%c128, %c0_16] : memref<192x128xbf16, #tpu.memory_space<vmem>>, vector<64x128xbf16>
    %cst_17 = arith.constant dense<0.000000e+00> : vector<32x128xf32>
    %43 = tpu.matmul %36, %42, %cst_17 {dimension_numbers = #tpu.dot_dimension_numbers<[1], [0], [0], [1], [0, 0, 1, 1], [], []>} : vector<32x64xbf16>, vector<64x128xbf16>, vector<32x128xf32> -> vector<32x128xf32>
    %44 = arith.addf %41, %43 : vector<32x128xf32>
    %cst_18 = arith.constant dense<0.000000e+00> : vector<128xf32>
    %45 = vector.multi_reduction <add>, %44, %cst_18 [0] : vector<32x128xf32> to vector<128xf32>
    %46 = vector.shape_cast %45 : vector<128xf32> to vector<1x128xf32>
    %47 = arith.mulf %44, %44 : vector<32x128xf32>
    %cst_19 = arith.constant dense<0.000000e+00> : vector<128xf32>
    %48 = vector.multi_reduction <add>, %47, %cst_19 [0] : vector<32x128xf32> to vector<128xf32>
    %49 = vector.shape_cast %48 : vector<128xf32> to vector<1x128xf32>
    %c0_20 = arith.constant 0 : index
    %c0_21 = arith.constant 0 : index
    %50 = vector.load %arg10[%c0_20, %c0_21] : memref<128x8xf32, #tpu.memory_space<vmem>>, vector<128x8xf32>
    %cst_22 = arith.constant dense<0.000000e+00> : vector<1x8xf32>
    %51 = tpu.matmul %46, %50, %cst_22 {dimension_numbers = #tpu.dot_dimension_numbers<[1], [0], [0], [1], [0, 0, 1, 1], [], []>} : vector<1x128xf32>, vector<128x8xf32>, vector<1x8xf32> -> vector<1x8xf32>
    %cst_23 = arith.constant 0.001953125 : f32
    %52 = vector.broadcast %cst_23 : f32 to vector<1x8xf32>
    %53 = arith.mulf %51, %52 : vector<1x8xf32>
    %c0_24 = arith.constant 0 : index
    %c0_25 = arith.constant 0 : index
    %54 = vector.load %arg11[%c0_24, %c0_25] : memref<8x128xf32, #tpu.memory_space<vmem>>, vector<8x128xf32>
    %cst_26 = arith.constant dense<0.000000e+00> : vector<1x128xf32>
    %55 = tpu.matmul %53, %54, %cst_26 {dimension_numbers = #tpu.dot_dimension_numbers<[1], [0], [0], [1], [0, 0, 1, 1], [], []>} : vector<1x8xf32>, vector<8x128xf32>, vector<1x128xf32> -> vector<1x128xf32>
    %c0_27 = arith.constant 0 : index
    %c0_28 = arith.constant 0 : index
    %56 = vector.load %arg10[%c0_27, %c0_28] : memref<128x8xf32, #tpu.memory_space<vmem>>, vector<128x8xf32>
    %cst_29 = arith.constant dense<0.000000e+00> : vector<1x8xf32>
    %57 = tpu.matmul %49, %56, %cst_29 {dimension_numbers = #tpu.dot_dimension_numbers<[1], [0], [0], [1], [0, 0, 1, 1], [], []>} : vector<1x128xf32>, vector<128x8xf32>, vector<1x8xf32> -> vector<1x8xf32>
    %cst_30 = arith.constant 0.001953125 : f32
    %58 = vector.broadcast %cst_30 : f32 to vector<1x8xf32>
    %59 = arith.mulf %57, %58 : vector<1x8xf32>
    %c0_31 = arith.constant 0 : index
    %c0_32 = arith.constant 0 : index
    %60 = vector.load %arg11[%c0_31, %c0_32] : memref<8x128xf32, #tpu.memory_space<vmem>>, vector<8x128xf32>
    %cst_33 = arith.constant dense<0.000000e+00> : vector<1x128xf32>
    %61 = tpu.matmul %59, %60, %cst_33 {dimension_numbers = #tpu.dot_dimension_numbers<[1], [0], [0], [1], [0, 0, 1, 1], [], []>} : vector<1x8xf32>, vector<8x128xf32>, vector<1x128xf32> -> vector<1x128xf32>
    %62 = arith.mulf %55, %55 : vector<1x128xf32>
    %63 = arith.subf %61, %62 : vector<1x128xf32>
    %cst_34 = arith.constant 0.000000e+00 : f32
    %64 = vector.broadcast %cst_34 : f32 to vector<1x128xf32>
    %65 = arith.maximumf %63, %64 : vector<1x128xf32>
    %c0_35 = arith.constant 0 : index
    %c0_36 = arith.constant 0 : index
    %66 = vector.load %arg4[%c0_35, %c0_36] : memref<1x128xf32, #tpu.memory_space<vmem>>, vector<1x128xf32>
    %cst_37 = arith.constant 9.99999974E-6 : f32
    %67 = vector.broadcast %cst_37 : f32 to vector<1x128xf32>
    %68 = arith.addf %65, %67 : vector<1x128xf32>
    %69 = math.rsqrt %68 : vector<1x128xf32>
    %70 = arith.mulf %66, %69 : vector<1x128xf32>
    %c0_38 = arith.constant 0 : index
    %c0_39 = arith.constant 0 : index
    %71 = vector.load %arg5[%c0_38, %c0_39] : memref<1x128xf32, #tpu.memory_space<vmem>>, vector<1x128xf32>
    %72 = arith.mulf %55, %70 : vector<1x128xf32>
    %73 = arith.subf %71, %72 : vector<1x128xf32>
    %74 = vector.broadcast %70 : vector<1x128xf32> to vector<32x128xf32>
    %75 = arith.mulf %44, %74 : vector<32x128xf32>
    %76 = vector.broadcast %73 : vector<1x128xf32> to vector<32x128xf32>
    %77 = arith.addf %75, %76 : vector<32x128xf32>
    %cst_40 = arith.constant 0.000000e+00 : f32
    %78 = vector.broadcast %cst_40 : f32 to vector<32x128xf32>
    %79 = arith.maximumf %77, %78 : vector<32x128xf32>
    %c8_41 = arith.constant 8 : index
    %c0_42 = arith.constant 0 : index
    %80 = vector.load %arg13[%c8_41, %c0_42] : memref<48x128xf32, #tpu.memory_space<vmem>>, vector<32x128xf32>
    tpu.vector_store %arg13[%c8_41, %c0_42], %79 {strides = array<i32>} : memref<48x128xf32, #tpu.memory_space<vmem>>, vector<32x128xf32>,
    %c8_43 = arith.constant 8 : index
    %c0_44 = arith.constant 0 : index
    %81 = vector.load %arg13[%c8_43, %c0_44] : memref<48x128xf32, #tpu.memory_space<vmem>>, vector<32x128xf32>
    %82 = arith.truncf %81 : vector<32x128xf32> to vector<32x128xbf16>
    %c7_45 = arith.constant 7 : index
    %c0_46 = arith.constant 0 : index
    %83 = vector.load %arg13[%c7_45, %c0_46] : memref<48x128xf32, #tpu.memory_space<vmem>>, vector<32x128xf32>
    %cst_47 = arith.constant 0.000000e+00 : f32
    %84 = vector.shape_cast %18 : vector<32x1xi1> to vector<32x1xi1>
    %85 = vector.broadcast %84 : vector<32x1xi1> to vector<32x128xi1>
    %86 = vector.broadcast %cst_47 : f32 to vector<32x128xf32>
    %87 = arith.select %85, %83, %86 : vector<32x128xi1>, vector<32x128xf32>
    %88 = arith.truncf %87 : vector<32x128xf32> to vector<32x128xbf16>
    %c9_48 = arith.constant 9 : index
    %c0_49 = arith.constant 0 : index
    %89 = vector.load %arg13[%c9_48, %c0_49] : memref<48x128xf32, #tpu.memory_space<vmem>>, vector<32x128xf32>
    %cst_50 = arith.constant 0.000000e+00 : f32
    %90 = vector.shape_cast %20 : vector<32x1xi1> to vector<32x1xi1>
    %91 = vector.broadcast %90 : vector<32x1xi1> to vector<32x128xi1>
    %92 = vector.broadcast %cst_50 : f32 to vector<32x128xf32>
    %93 = arith.select %91, %89, %92 : vector<32x128xi1>, vector<32x128xf32>
    %94 = arith.truncf %93 : vector<32x128xf32> to vector<32x128xbf16>
    %c0_51 = arith.constant 0 : index
    %c0_52 = arith.constant 0 : index
    %95 = vector.load %arg2[%c0_51, %c0_52] : memref<384x128xbf16, #tpu.memory_space<vmem>>, vector<128x128xbf16>
    %cst_53 = arith.constant dense<0.000000e+00> : vector<32x128xf32>
    %96 = tpu.matmul %88, %95, %cst_53 {dimension_numbers = #tpu.dot_dimension_numbers<[1], [0], [0], [1], [0, 0, 1, 1], [], []>} : vector<32x128xbf16>, vector<128x128xbf16>, vector<32x128xf32> -> vector<32x128xf32>
    %c128_54 = arith.constant 128 : index
    %c0_55 = arith.constant 0 : index
    %97 = vector.load %arg2[%c128_54, %c0_55] : memref<384x128xbf16, #tpu.memory_space<vmem>>, vector<128x128xbf16>
    %cst_56 = arith.constant dense<0.000000e+00> : vector<32x128xf32>
    %98 = tpu.matmul %82, %97, %cst_56 {dimension_numbers = #tpu.dot_dimension_numbers<[1], [0], [0], [1], [0, 0, 1, 1], [], []>} : vector<32x128xbf16>, vector<128x128xbf16>, vector<32x128xf32> -> vector<32x128xf32>
    %99 = arith.addf %96, %98 : vector<32x128xf32>
    %c256 = arith.constant 256 : index
    %c0_57 = arith.constant 0 : index
    %100 = vector.load %arg2[%c256, %c0_57] : memref<384x128xbf16, #tpu.memory_space<vmem>>, vector<128x128xbf16>
    %cst_58 = arith.constant dense<0.000000e+00> : vector<32x128xf32>
    %101 = tpu.matmul %94, %100, %cst_58 {dimension_numbers = #tpu.dot_dimension_numbers<[1], [0], [0], [1], [0, 0, 1, 1], [], []>} : vector<32x128xbf16>, vector<128x128xbf16>, vector<32x128xf32> -> vector<32x128xf32>
    %102 = arith.addf %99, %101 : vector<32x128xf32>
    %cst_59 = arith.constant dense<0.000000e+00> : vector<128xf32>
    %103 = vector.multi_reduction <add>, %102, %cst_59 [0] : vector<32x128xf32> to vector<128xf32>
    %104 = vector.shape_cast %103 : vector<128xf32> to vector<1x128xf32>
    %105 = arith.mulf %102, %102 : vector<32x128xf32>
    %cst_60 = arith.constant dense<0.000000e+00> : vector<128xf32>
    %106 = vector.multi_reduction <add>, %105, %cst_60 [0] : vector<32x128xf32> to vector<128xf32>
    %107 = vector.shape_cast %106 : vector<128xf32> to vector<1x128xf32>
    %c0_61 = arith.constant 0 : index
    %c0_62 = arith.constant 0 : index
    %108 = vector.load %arg10[%c0_61, %c0_62] : memref<128x8xf32, #tpu.memory_space<vmem>>, vector<128x8xf32>
    %cst_63 = arith.constant dense<0.000000e+00> : vector<1x8xf32>
    %109 = tpu.matmul %104, %108, %cst_63 {dimension_numbers = #tpu.dot_dimension_numbers<[1], [0], [0], [1], [0, 0, 1, 1], [], []>} : vector<1x128xf32>, vector<128x8xf32>, vector<1x8xf32> -> vector<1x8xf32>
    %cst_64 = arith.constant 0.001953125 : f32
    %110 = vector.broadcast %cst_64 : f32 to vector<1x8xf32>
    %111 = arith.mulf %109, %110 : vector<1x8xf32>
    %c0_65 = arith.constant 0 : index
    %c0_66 = arith.constant 0 : index
    %112 = vector.load %arg11[%c0_65, %c0_66] : memref<8x128xf32, #tpu.memory_space<vmem>>, vector<8x128xf32>
    %cst_67 = arith.constant dense<0.000000e+00> : vector<1x128xf32>
    %113 = tpu.matmul %111, %112, %cst_67 {dimension_numbers = #tpu.dot_dimension_numbers<[1], [0], [0], [1], [0, 0, 1, 1], [], []>} : vector<1x8xf32>, vector<8x128xf32>, vector<1x128xf32> -> vector<1x128xf32>
    %c0_68 = arith.constant 0 : index
    %c0_69 = arith.constant 0 : index
    %114 = vector.load %arg10[%c0_68, %c0_69] : memref<128x8xf32, #tpu.memory_space<vmem>>, vector<128x8xf32>
    %cst_70 = arith.constant dense<0.000000e+00> : vector<1x8xf32>
    %115 = tpu.matmul %107, %114, %cst_70 {dimension_numbers = #tpu.dot_dimension_numbers<[1], [0], [0], [1], [0, 0, 1, 1], [], []>} : vector<1x128xf32>, vector<128x8xf32>, vector<1x8xf32> -> vector<1x8xf32>
    %cst_71 = arith.constant 0.001953125 : f32
    %116 = vector.broadcast %cst_71 : f32 to vector<1x8xf32>
    %117 = arith.mulf %115, %116 : vector<1x8xf32>
    %c0_72 = arith.constant 0 : index
    %c0_73 = arith.constant 0 : index
    %118 = vector.load %arg11[%c0_72, %c0_73] : memref<8x128xf32, #tpu.memory_space<vmem>>, vector<8x128xf32>
    %cst_74 = arith.constant dense<0.000000e+00> : vector<1x128xf32>
    %119 = tpu.matmul %117, %118, %cst_74 {dimension_numbers = #tpu.dot_dimension_numbers<[1], [0], [0], [1], [0, 0, 1, 1], [], []>} : vector<1x8xf32>, vector<8x128xf32>, vector<1x128xf32> -> vector<1x128xf32>
    %120 = arith.mulf %113, %113 : vector<1x128xf32>
    %121 = arith.subf %119, %120 : vector<1x128xf32>
    %cst_75 = arith.constant 0.000000e+00 : f32
    %122 = vector.broadcast %cst_75 : f32 to vector<1x128xf32>
    %123 = arith.maximumf %121, %122 : vector<1x128xf32>
    %c0_76 = arith.constant 0 : index
    %c0_77 = arith.constant 0 : index
    %124 = vector.load %arg6[%c0_76, %c0_77] : memref<1x128xf32, #tpu.memory_space<vmem>>, vector<1x128xf32>
    %cst_78 = arith.constant 9.99999974E-6 : f32
    %125 = vector.broadcast %cst_78 : f32 to vector<1x128xf32>
    %126 = arith.addf %123, %125 : vector<1x128xf32>
    %127 = math.rsqrt %126 : vector<1x128xf32>
    %128 = arith.mulf %124, %127 : vector<1x128xf32>
    %c0_79 = arith.constant 0 : index
    %c0_80 = arith.constant 0 : index
    %129 = vector.load %arg7[%c0_79, %c0_80] : memref<1x128xf32, #tpu.memory_space<vmem>>, vector<1x128xf32>
    %130 = arith.mulf %113, %128 : vector<1x128xf32>
    %131 = arith.subf %129, %130 : vector<1x128xf32>
    %132 = vector.broadcast %128 : vector<1x128xf32> to vector<32x128xf32>
    %133 = arith.mulf %102, %132 : vector<32x128xf32>
    %134 = vector.broadcast %131 : vector<1x128xf32> to vector<32x128xf32>
    %135 = arith.addf %133, %134 : vector<32x128xf32>
    %136 = arith.truncf %21 : vector<32x64xf32> to vector<32x64xbf16>
    %c0_81 = arith.constant 0 : index
    %c0_82 = arith.constant 0 : index
    %137 = vector.load %arg3[%c0_81, %c0_82] : memref<64x128xbf16, #tpu.memory_space<vmem>>, vector<64x128xbf16>
    %cst_83 = arith.constant dense<0.000000e+00> : vector<32x128xf32>
    %138 = tpu.matmul %136, %137, %cst_83 {dimension_numbers = #tpu.dot_dimension_numbers<[1], [0], [0], [1], [0, 0, 1, 1], [], []>} : vector<32x64xbf16>, vector<64x128xbf16>, vector<32x128xf32> -> vector<32x128xf32>
    %cst_84 = arith.constant dense<0.000000e+00> : vector<128xf32>
    %139 = vector.multi_reduction <add>, %138, %cst_84 [0] : vector<32x128xf32> to vector<128xf32>
    %140 = vector.shape_cast %139 : vector<128xf32> to vector<1x128xf32>
    %141 = arith.mulf %138, %138 : vector<32x128xf32>
    %cst_85 = arith.constant dense<0.000000e+00> : vector<128xf32>
    %142 = vector.multi_reduction <add>, %141, %cst_85 [0] : vector<32x128xf32> to vector<128xf32>
    %143 = vector.shape_cast %142 : vector<128xf32> to vector<1x128xf32>
    %c0_86 = arith.constant 0 : index
    %c0_87 = arith.constant 0 : index
    %144 = vector.load %arg10[%c0_86, %c0_87] : memref<128x8xf32, #tpu.memory_space<vmem>>, vector<128x8xf32>
    %cst_88 = arith.constant dense<0.000000e+00> : vector<1x8xf32>
    %145 = tpu.matmul %140, %144, %cst_88 {dimension_numbers = #tpu.dot_dimension_numbers<[1], [0], [0], [1], [0, 0, 1, 1], [], []>} : vector<1x128xf32>, vector<128x8xf32>, vector<1x8xf32> -> vector<1x8xf32>
    %cst_89 = arith.constant 0.001953125 : f32
    %146 = vector.broadcast %cst_89 : f32 to vector<1x8xf32>
    %147 = arith.mulf %145, %146 : vector<1x8xf32>
    %c0_90 = arith.constant 0 : index
    %c0_91 = arith.constant 0 : index
    %148 = vector.load %arg11[%c0_90, %c0_91] : memref<8x128xf32, #tpu.memory_space<vmem>>, vector<8x128xf32>
    %cst_92 = arith.constant dense<0.000000e+00> : vector<1x128xf32>
    %149 = tpu.matmul %147, %148, %cst_92 {dimension_numbers = #tpu.dot_dimension_numbers<[1], [0], [0], [1], [0, 0, 1, 1], [], []>} : vector<1x8xf32>, vector<8x128xf32>, vector<1x128xf32> -> vector<1x128xf32>
    %c0_93 = arith.constant 0 : index
    %c0_94 = arith.constant 0 : index
    %150 = vector.load %arg10[%c0_93, %c0_94] : memref<128x8xf32, #tpu.memory_space<vmem>>, vector<128x8xf32>
    %cst_95 = arith.constant dense<0.000000e+00> : vector<1x8xf32>
    %151 = tpu.matmul %143, %150, %cst_95 {dimension_numbers = #tpu.dot_dimension_numbers<[1], [0], [0], [1], [0, 0, 1, 1], [], []>} : vector<1x128xf32>, vector<128x8xf32>, vector<1x8xf32> -> vector<1x8xf32>
    %cst_96 = arith.constant 0.001953125 : f32
    %152 = vector.broadcast %cst_96 : f32 to vector<1x8xf32>
    %153 = arith.mulf %151, %152 : vector<1x8xf32>
    %c0_97 = arith.constant 0 : index
    %c0_98 = arith.constant 0 : index
    %154 = vector.load %arg11[%c0_97, %c0_98] : memref<8x128xf32, #tpu.memory_space<vmem>>, vector<8x128xf32>
    %cst_99 = arith.constant dense<0.000000e+00> : vector<1x128xf32>
    %155 = tpu.matmul %153, %154, %cst_99 {dimension_numbers = #tpu.dot_dimension_numbers<[1], [0], [0], [1], [0, 0, 1, 1], [], []>} : vector<1x8xf32>, vector<8x128xf32>, vector<1x128xf32> -> vector<1x128xf32>
    %156 = arith.mulf %149, %149 : vector<1x128xf32>
    %157 = arith.subf %155, %156 : vector<1x128xf32>
    %cst_100 = arith.constant 0.000000e+00 : f32
    %158 = vector.broadcast %cst_100 : f32 to vector<1x128xf32>
    %159 = arith.maximumf %157, %158 : vector<1x128xf32>
    %c0_101 = arith.constant 0 : index
    %c0_102 = arith.constant 0 : index
    %160 = vector.load %arg8[%c0_101, %c0_102] : memref<1x128xf32, #tpu.memory_space<vmem>>, vector<1x128xf32>
    %cst_103 = arith.constant 9.99999974E-6 : f32
    %161 = vector.broadcast %cst_103 : f32 to vector<1x128xf32>
    %162 = arith.addf %159, %161 : vector<1x128xf32>
    %163 = math.rsqrt %162 : vector<1x128xf32>
    %164 = arith.mulf %160, %163 : vector<1x128xf32>
    %c0_104 = arith.constant 0 : index
    %c0_105 = arith.constant 0 : index
    %165 = vector.load %arg9[%c0_104, %c0_105] : memref<1x128xf32, #tpu.memory_space<vmem>>, vector<1x128xf32>
    %166 = arith.mulf %149, %164 : vector<1x128xf32>
    %167 = arith.subf %165, %166 : vector<1x128xf32>
    %168 = vector.broadcast %164 : vector<1x128xf32> to vector<32x128xf32>
    %169 = arith.mulf %138, %168 : vector<32x128xf32>
    %170 = vector.broadcast %167 : vector<1x128xf32> to vector<32x128xf32>
    %171 = arith.addf %169, %170 : vector<32x128xf32>
    %172 = arith.addf %135, %171 : vector<32x128xf32>
    %cst_106 = arith.constant 0.000000e+00 : f32
    %173 = vector.broadcast %cst_106 : f32 to vector<32x128xf32>
    %174 = arith.maximumf %172, %173 : vector<32x128xf32>
    %c0_107 = arith.constant 0 : index
    %c0_108 = arith.constant 0 : index
    %175 = vector.load %arg12[%c0_107, %c0_108] : memref<32x128xf32, #tpu.memory_space<vmem>>, vector<32x128xf32>
    tpu.vector_store %arg12[%c0_107, %c0_108], %174 {strides = array<i32>} : memref<32x128xf32, #tpu.memory_space<vmem>>, vector<32x128xf32>,
    return
  }
}

</mosaic_0001>

<bundles_post_ra>
// kernel: tpu_custom_call.1
= control target key start
LH: loop header
LB: loop body
LE: loop exit
PB: predicated region body
PF: predicated region fallthrough
CT: control target
= control target key end

     0   :  { %17 = vsyncpa [#allocation4], 0  ;;  %s2207_s0 = inlined_call_operand.vmem [shape: f32[32,64], index: 0, kind: input, shape index: {}]   ;;  %s2208_s1 = inlined_call_operand.vmem [shape: bf16[192,128], index: 1, kind: input, shape index: {}]   ;;  %s2209_s2 = inlined_call_operand.hbm [shape: bf16[384,128], index: 2, kind: input, shape index: {}]   ;;  %s2210_s3 = inlined_call_operand.hbm [shape: bf16[64,128], index: 3, kind: input, shape index: {}]   ;;  %s2211_s4 = inlined_call_operand.vmem [shape: f32[1,128], index: 4, kind: input, shape index: {}]   ;;  %s2212_s5 = inlined_call_operand.hbm [shape: f32[1,128], index: 5, kind: input, shape index: {}]   ;;  %s2213_s6 = inlined_call_operand.hbm [shape: f32[1,128], index: 6, kind: input, shape index: {}]   ;;  %s2214_s7 = inlined_call_operand.hbm [shape: f32[1,128], index: 7, kind: input, shape index: {}]   ;;  %s2215_s8 = inlined_call_operand.hbm [shape: f32[1,128], index: 8, kind: input, shape index: {}]   ;;  %s2216_s9 = inlined_call_operand.hbm [shape: f32[1,128], index: 9, kind: input, shape index: {}]   ;;  %s2217_s10 = inlined_call_operand.vmem [shape: f32[128,8], index: 10, kind: input, shape index: {}]   ;;  %s2218_s11 = inlined_call_operand.vmem [shape: f32[8,128], index: 11, kind: input, shape index: {}]   ;;  %s2219_s12 = inlined_call_operand.hbm [shape: f32[32,128], index: 12, kind: output, shape index: {}]  }
   0x1   :  { %18 = vsyncpa [#allocation7], 0 }
   0x2   :  { %19 = vsyncpa [#allocation10], 0 }
   0x3   :  { %20 = vsyncpa [#allocation13], 0 }
   0x4   :  { %21 = vsyncpa [#allocation5], 0  ;;  %s43_s23 = sshll.u32 %s2210_s3, 4  ;;  %s1720_s24 = smov [#allocation6]   ;;  %s44_s23 = int_to_ptr.hbm [resolvable:$true] %s43_s23 }
   0x5   :  { %s45_s25 = sshll.u32 %s1720_s24, 4  ;;  %s70_s28 = sshll.u32 %s2213_s6, 4  ;;  %s46_s25 = int_to_ptr.vmem [resolvable:$true] %s45_s25  ;;  %s71_s28 = int_to_ptr.hbm [resolvable:$true] %s70_s28 }
   0x6   :  { %s1721_s29 = smov 64   ;;  %s1722_s30 = smov 4  }
   0x7   :  { %51 = dma.hbm_to_vmem [thread:$0]  %s44_s23, 512, %s46_s25, [#allocation7], %s1721_s29, %s1721_s29, %s1722_s30  }
   0x8   :  { %s1723_s13 = smov [#allocation9]   ;;  %s92_s17 = sshll.u32 %s2215_s8, 4  ;;  %s93_s17 = int_to_ptr.hbm [resolvable:$true] %s92_s17 }
   0x9   :  { %s72_s14 = sshll.u32 %s1723_s13, 4  ;;  %s30_s19 = sshll.u32 %s2209_s2, 4  ;;  %s73_s14 = int_to_ptr.vmem [resolvable:$true] %s72_s14  ;;  %s31_s19 = int_to_ptr.hbm [resolvable:$true] %s30_s19 }
   0xa   :  { %75 = dma.hbm_to_vmem [thread:$0]  %s71_s28, 16, %s73_s14, [#allocation10]  }
   0xb   :  { %s1724_s20 = smov [#allocation12]   ;;  %s1725_s6 = smov [#allocation3]  }
   0xc   :  { %s94_s21 = sshll.u32 %s1724_s20, 4  ;;  %s32_s22 = sshll.u32 %s1725_s6, 4  ;;  %s95_s21 = int_to_ptr.vmem [resolvable:$true] %s94_s21  ;;  %s33_s22 = int_to_ptr.vmem [resolvable:$true] %s32_s22 }
   0xd   :  { %97 = dma.hbm_to_vmem [thread:$0]  %s93_s17, 16, %s95_s21, [#allocation13]  }
   0xe   :  { %s59_s25 = sshll.u32 %s2212_s5, 4  ;;  %s81_s27 = sshll.u32 %s2214_s7, 4  ;;  %s60_s25 = int_to_ptr.hbm [resolvable:$true] %s59_s25  ;;  %s82_s27 = int_to_ptr.hbm [resolvable:$true] %s81_s27 }
   0xf   :  { %38 = dma.hbm_to_vmem [thread:$0]  %s31_s19, 3072, %s33_s22, [#allocation4], %s1721_s29, %s1721_s29, %s1722_s30  }
  0x10   :  { %s1726_s28 = smov [#allocation8]   ;;  %s1727_s13 = smov [#allocation11]  }
  0x11   :  { %s61_s2 = sshll.u32 %s1726_s28, 4  ;;  %s83_s14 = sshll.u32 %s1727_s13, 4  ;;  %s62_s2 = int_to_ptr.vmem [resolvable:$true] %s61_s2  ;;  %s84_s14 = int_to_ptr.vmem [resolvable:$true] %s83_s14 }
  0x12   :  { %64 = dma.hbm_to_vmem [thread:$0]  %s60_s25, 16, %s62_s2, [#allocation7]  }
  0x13   :  { %s103_s17 = sshll.u32 %s2216_s9, 4  ;;  %s1728_s5 = smov [#allocation14]   ;;  %s104_s17 = int_to_ptr.hbm [resolvable:$true] %s103_s17 }
  0x14   :  { %86 = dma.hbm_to_vmem [thread:$0]  %s82_s27, 16, %s84_s14, [#allocation10]  }
  0x15   :  { %s105_s29 = sshll.u32 %s1728_s5, 4  ;;  %s106_s29 = int_to_ptr.vmem [resolvable:$true] %s105_s29 }
  0x16   :  { %108 = dma.hbm_to_vmem [thread:$0]  %s104_s17, 16, %s106_s29, [#allocation13]  }
  0x17   :  { %1710 = dma.done.wait [#allocation4], 3072  }
  0x18   :  { %1711 = vsyncadd [#allocation4], 4294964224 }
  0x19   :  { %1712 = dma.done.wait [#allocation7], 528  }
  0x1a   :  { %1713 = vsyncadd [#allocation7], 4294966768 }
  0x1b   :  { %1714 = dma.done.wait [#allocation10], 32  }
  0x1c   :  { %1715 = vsyncadd [#allocation10], 4294967264 }
  0x1d   :  { %1716 = dma.done.wait [#allocation13], 32  }
  0x1e   :  { %1717 = vsyncadd [#allocation13], 4294967264  ;;  %v142_v0 = vlaneseq  ;;  %v1466_v1 = vld [vmem:[%s2208_s1 + $0x38] sm:$0xff]  ;;  %v1465_v5 = vld [vmem:[%s2208_s1 + $0x30] sm:$0xff]  ;;  %vm207_vm0 = vcmask 523264   ;;  %vm489_vm5 = vcmask 64512  }
  0x1f   :  { %v1462_v2 = vld [vmem:[%s2208_s1 + $0x18] sm:$0xff]  ;;  %304 = vmatpush.bf16.msra.mxu0 %v1466_v1  ;;  %v1461_v6 = vld [vmem:[%s2208_s1 + $0x10] sm:$0xff]  ;;  %v1840_v8 = vld [vmem:[%s2207_s0] sm:$0xff]  ;;  %vm1729_vm9 = vmmov 1   ;;  %s1257_s27 = sshll.u32 %s2219_s12, 4  ;;  %s1731_s28 = smov 128   ;;  %s1258_s27 = int_to_ptr.hbm [resolvable:$true] %s1257_s27 }
  0x20   :  { %v1470_v3 = vld [vmem:[%s2208_s1 + $0x58] sm:$0xff]  ;;  %v143_v4 = vshrl.u32 %v142_v0, 7  ;;  %353 = vmatpush.bf16.msra.mxu1 %v1462_v2  ;;  %v1469_v7 = vld [vmem:[%s2208_s1 + $0x50] sm:$0xff]  ;;  %v1845_v9 = vld [vmem:[%s2207_s0 + $0x8] sm:$0xff]  ;;  %208 = vst.msk [vmem:[#allocation2 + $0x8] sm:$0xff] %vm207_vm0, %v1840_v8  ;;  %s1732_s2 = smov 8  }
  0x21   :  { %410 = vmatpush.bf16.msra.mxu2 %v1470_v3  ;;  %v1850_v11 = vld [vmem:[%s2207_s0 + $0x10] sm:$0xff]  ;;  %v1857_v12 = vld [vmem:[%s2207_s0 + $0x18] sm:$0xff]  ;;  %v1464_v13 = vld [vmem:[%s2208_s1 + $0x28] sm:$0xff]  ;;  %209 = vst.msk [vmem:[#allocation2 + $0x10] sm:$0xff] %vm207_vm0, %v1845_v9 }
  0x22   :  { %v144_v10 = vadd.s32 8, %v143_v4  ;;  %v1460_v14 = vld [vmem:[%s2208_s1 + $0x8] sm:$0xff]  ;;  %v151_v15 = vand.u32 15, %v143_v4  ;;  %210 = vst.msk [vmem:[#allocation2 + $0x18] sm:$0xff] %vm207_vm0, %v1850_v11  ;;  %v1463_v18 = vld [vmem:[%s2208_s1 + $0x20] sm:$0xff]  ;;  %v145_v33 = vadd.s32 16, %v143_v4 }
  0x23   :  { %305 = vmatpush.bf16.msra.mxu0 %v1465_v5  ;;  %v1468_v16 = vld [vmem:[%s2208_s1 + $0x48] sm:$0xff]  ;;  %211 = vst.msk [vmem:[#allocation2 + $0x20] sm:$0xff] %vm207_vm0, %v1857_v12  ;;  %v1459_v19 = vld [vmem:[%s2208_s1] sm:$0xff]  ;;  %v146_v35 = vadd.s32 24, %v143_v4  ;;  %v1916_v51 = vld [vmem:[%s2217_s10 + $0x78] sm:$0xff] }
  0x24   :  { %354 = vmatpush.bf16.msra.mxu1 %v1461_v6  ;;  %v158_v17 = vand.u32 15, %v144_v10  ;;  %vm1880_vm1 = vcmp.ge.s32.totalorder %v151_v15, 1  ;;  %v1467_v21 = vld [vmem:[%s2208_s1 + $0x40] sm:$0xff]  ;;  %v165_v36 = vand.u32 15, %v145_v33  ;;  %467 = vmatpush.msra.mxu3 %v1916_v51  ;;  %v1923_v52 = vld [vmem:[%s2217_s10 + $0x70] sm:$0xff]  ;;  %v1931_v53 = vld [vmem:[%s2217_s10 + $0x68] sm:$0xff] }
  0x25   :  { %411 = vmatpush.bf16.msra.mxu2 %v1469_v7  ;;  %v172_v37 = vand.u32 15, %v146_v35  ;;  %v1939_v54 = vld [vmem:[%s2217_s10 + $0x60] sm:$0xff]  ;;  %v1947_v55 = vld [vmem:[%s2217_s10 + $0x58] sm:$0xff]  ;;  %v1955_v56 = vld [vmem:[%s2217_s10 + $0x50] sm:$0xff] }
  0x26   :  { %vm1887_vm2 = vcmp.lt.s32.totalorder %v158_v17, 15  ;;  %vm1898_vm3 = vcmp.ge.s32.totalorder %v165_v36, 1  ;;  %468 = vmatpush.msra.mxu3 %v1923_v52  ;;  %v1963_v57 = vld [vmem:[%s2217_s10 + $0x48] sm:$0xff]  ;;  %v1971_v58 = vld [vmem:[%s2217_s10 + $0x40] sm:$0xff]  ;;  %v1979_v61 = vld [vmem:[%s2217_s10 + $0x38] sm:$0xff] }
  0x27   :  { %306 = vmatpush.bf16.msra.mxu0 %v1464_v13  ;;  %v212_v22 = vld [vmem:[#allocation2 + $0x8] sm:$0xff]  ;;  %vm1902_vm4 = vcmp.lt.s32.totalorder %v172_v37, 15  ;;  %v1987_v62 = vld [vmem:[%s2217_s10 + $0x30] sm:$0xff]  ;;  %v2003_v0 = vld [vmem:[%s2217_s10 + $0x20] sm:$0xff] }
  0x28   :  { %355 = vmatpush.bf16.msra.mxu1 %v1460_v14  ;;  %v218_v23 = vld [vmem:[#allocation2 + $0x7] sm:$0xff]  ;;  %v213_v25 = vld [vmem:[#allocation2 + $0x10] sm:$0xff]  ;;  %469 = vmatpush.msra.mxu3 %v1931_v53  ;;  %v2008_v1 = vld [vmem:[%s2217_s10 + $0x18] sm:$0xff] }
  0x29   :  { %412 = vmatpush.bf16.msra.mxu2 %v1468_v16  ;;  %v219_v26 = vld [vmem:[#allocation2 + $0xf] sm:$0xff]  ;;  %v230_v27 = vsel %vm1880_vm1, %v218_v23, 0.0  ;;  %v216_v29 = vpack.c.bf16 %v213_v25, %v212_v22  ;;  %v220_v39 = vld [vmem:[#allocation2 + $0x17] sm:$0xff]  ;;  %v2032_v7 = vld [vmem:[%s2217_s10] sm:$0xff] }
  0x2a   :  { %v236_v28 = vld [vmem:[#allocation2 + $0x9] sm:$0xff]  ;;  %v234_v30 = vpack.c.bf16 %v219_v26, %v230_v27  ;;  %v237_v31 = vld [vmem:[#allocation2 + $0x11] sm:$0xff]  ;;  %v239_v41 = vld [vmem:[#allocation2 + $0x21] sm:$0xff]  ;;  %v232_v45 = vsel %vm1898_vm3, %v220_v39, 0.0  ;;  %470 = vmatpush.msra.mxu3 %v1939_v54 }
  0x2b   :  { %307 = vmatpush.bf16.msra.mxu0 %v1463_v18  ;;  %v249_v32 = vsel %vm1887_vm2, %v237_v31, 0.0  ;;  %v214_v42 = vld [vmem:[#allocation2 + $0x18] sm:$0xff]  ;;  %v215_v43 = vld [vmem:[#allocation2 + $0x20] sm:$0xff]  ;;  %v251_v47 = vsel %vm1902_vm4, %v239_v41, 0.0  ;;  %v1995_v63 = vld [vmem:[%s2217_s10 + $0x28] sm:$0xff] }
  0x2c   :  { %356 = vmatpush.bf16.msra.mxu1 %v1459_v19  ;;  %v252_v34 = vpack.c.bf16 %v249_v32, %v236_v28  ;;  %v221_v44 = vld [vmem:[#allocation2 + $0x1f] sm:$0xff]  ;;  %v217_v48 = vpack.c.bf16 %v215_v43, %v214_v42  ;;  %471 = vmatpush.msra.mxu3 %v1947_v55  ;;  %v2016_v5 = vld [vmem:[%s2217_s10 + $0x10] sm:$0xff]  ;;  %v2024_v6 = vld [vmem:[%s2217_s10 + $0x8] sm:$0xff] }
  0x2d   :  { %413 = vmatpush.bf16.msra.mxu2 %v1467_v21  ;;  %v238_v46 = vld [vmem:[#allocation2 + $0x19] sm:$0xff]  ;;  %v235_v49 = vpack.c.bf16 %v221_v44, %v232_v45  ;;  %vm1393_vm10 = vmpackc.low %vm1729_vm9, %vm1880_vm1 }
  0x2e   :  { %1289 = vmatmul.msk.bf16.vlgmr.msra.gmra.mxu0 %vm207_vm0, %v216_v29  ;;  %v253_v50 = vpack.c.bf16 %v251_v47, %v238_v46  ;;  %472 = vmatpush.msra.mxu3 %v1955_v56  ;;  %v2044_v15 = vld [vmem:[%s2218_s11] sm:$0xff]  ;;  %vm1431_vm11 = vmpackc.low %vm1887_vm2, %vm1729_vm9 }
  0x2f   :  { %1307 = vmatmul.msk.bf16.vlgmr.msra.gmra.mxu1 %vm207_vm0, %v234_v30  ;;  %513 = vmatpush.msrb.mxu0 %v1916_v51  ;;  %vm1396_vm12 = vmpackc.low %vm1729_vm9, %vm1898_vm3 }
  0x30   :  { %1325 = vmatmul.msk.bf16.vlgmr.msra.gmra.mxu2 %vm207_vm0, %v252_v34  ;;  %915 = vmatpush.msrb.mxu1 %v1916_v51  ;;  %vm1434_vm13 = vmpackc.low %vm1902_vm4, %vm1729_vm9 }
  0x31   :  { %514 = vmatpush.msrb.mxu0 %v1923_v52  ;;  %473 = vmatpush.msra.mxu3 %v1963_v57 }
  0x32   :  { %916 = vmatpush.msrb.mxu1 %v1923_v52 }
  0x33   :  { %515 = vmatpush.msrb.mxu0 %v1931_v53  ;;  %474 = vmatpush.msra.mxu3 %v1971_v58 }
  0x34   :  { %917 = vmatpush.msrb.mxu1 %v1931_v53 }
  0x35   :  { %516 = vmatpush.msrb.mxu0 %v1939_v54  ;;  %475 = vmatpush.msra.mxu3 %v1979_v61 }
  0x36   :  { %918 = vmatpush.msrb.mxu1 %v1939_v54 }
  0x37   :  { %517 = vmatpush.msrb.mxu0 %v1947_v55  ;;  %476 = vmatpush.msra.mxu3 %v1987_v62 }
  0x38   :  { %919 = vmatpush.msrb.mxu1 %v1947_v55 }
  0x39   :  { %518 = vmatpush.msrb.mxu0 %v1955_v56  ;;  %477 = vmatpush.msra.mxu3 %v1995_v63 }
  0x3a   :  { %920 = vmatpush.msrb.mxu1 %v1955_v56 }
  0x3b   :  { %519 = vmatpush.msrb.mxu0 %v1963_v57  ;;  %478 = vmatpush.msra.mxu3 %v2003_v0 }
  0x3c   :  { %921 = vmatpush.msrb.mxu1 %v1963_v57 }
  0x3d   :  { %520 = vmatpush.msrb.mxu0 %v1971_v58  ;;  %479 = vmatpush.msra.mxu3 %v2008_v1 }
  0x3e   :  { %1290 = vmatmul.msk.bf16.gmra.mxu0 %vm207_vm0, %v217_v48  ;;  %922 = vmatpush.msrb.mxu1 %v1971_v58 }
  0x3f   :  { %1308 = vmatmul.msk.bf16.gmra.mxu1 %vm207_vm0, %v235_v49  ;;  %521 = vmatpush.msrb.mxu0 %v1979_v61 }
  0x40   :  { %1326 = vmatmul.msk.bf16.gmra.mxu2 %vm207_vm0, %v253_v50  ;;  %923 = vmatpush.msrb.mxu1 %v1979_v61 }
  0x41   :  { %522 = vmatpush.msrb.mxu0 %v1987_v62  ;;  %480 = vmatpush.msra.mxu3 %v2016_v5 }
  0x42   :  { %924 = vmatpush.msrb.mxu1 %v1987_v62 }
  0x43   :  { %523 = vmatpush.msrb.mxu0 %v1995_v63  ;;  %481 = vmatpush.msra.mxu3 %v2024_v6 }
  0x44   :  { %925 = vmatpush.msrb.mxu1 %v1995_v63 }
  0x45   :  { %524 = vmatpush.msrb.mxu0 %v2003_v0  ;;  %482 = vmatpush.msra.mxu3 %v2032_v7 }
  0x46   :  { %926 = vmatpush.msrb.mxu1 %v2003_v0 }
  0x47   :  { %525 = vmatpush.msrb.mxu0 %v2008_v1  ;;  %508 = vmatpush.msrb.mxu3 %v2044_v15 }
  0x48   :  { %927 = vmatpush.msrb.mxu1 %v2008_v1 }
  0x49   :  { %526 = vmatpush.msrb.mxu0 %v2016_v5 }
  0x4a   :  { %928 = vmatpush.msrb.mxu1 %v2016_v5 }
  0x4b   :  { %527 = vmatpush.msrb.mxu0 %v2024_v6 }
  0x4c   :  { %929 = vmatpush.msrb.mxu1 %v2024_v6 }
  0x4d   :  { %528 = vmatpush.msrb.mxu0 %v2032_v7 }
  0x4e   :  { %930 = vmatpush.msrb.mxu1 %v2032_v7 }
  0x4f   :  { %552 = vmatpush.msra.mxu0 %v2044_v15 }
  0x50   :  { %999 = vmatpush.msra.mxu1 %v2044_v15 }
  0xab   :  { %v309_v59 = vpop.f32.mrf.mxu0 }
  0xac   :  { %v358_v60 = vpop.f32.mrf.mxu1 }
  0xad   :  { %v359_v16 = vadd.f32 %v358_v60, %v309_v59 }
  0xb3   :  { %v415_v2 = vpop.f32.mrf.mxu2  ;;  %v311_v3 = vpop.f32.mrf.mxu0 }
  0xb4   :  { %v360_v4 = vpop.f32.mrf.mxu1  ;;  %v2051_v22 = vadd.f32 %v415_v2, %v359_v16  ;;  %v1485_v16 = vld [vmem:[#allocation3 + $0x70] sm:$0xff] }
  0xb5   :  { %v361_v17 = vadd.f32 %v360_v4, %v311_v3 }
  0xb6   :  { %v438_v28 = vmul.f32 %v2051_v22, %v2051_v22 }
  0xbb   :  { %v417_v10 = vpop.f32.mrf.mxu2  ;;  %v314_v13 = vpop.f32.mrf.mxu0 }
  0xbc   :  { %v363_v14 = vpop.f32.mrf.mxu1  ;;  %v2049_v21 = vadd.f32 %v417_v10, %v361_v17  ;;  %v1478_v17 = vld [vmem:[#allocation3 + $0x38] sm:$0xff] }
  0xbd   :  { %v364_v18 = vadd.f32 %v363_v14, %v314_v13  ;;  %v1486_v14 = vld [vmem:[#allocation3 + $0x78] sm:$0xff] }
  0xbe   :  { %v439_v27 = vmul.f32 %v2049_v21, %v2049_v21  ;;  %v429_v29 = vadd.f32 %v2049_v21, %v2051_v22  ;;  %704 = vmatpush.bf16.msrb.mxu2 %v1486_v14  ;;  %v560_v14 = vld [vmem:[%s2211_s4] sm:$0x1]  ;;  %s1730_s4 = smov [#allocation15]  }
  0xbf   :  { %s1255_s25 = sshll.u32 %s1730_s4, 4  ;;  %s1256_s25 = int_to_ptr.vmem [resolvable:$true] %s1255_s25 }
  0xc0   :  { %v442_v33 = vadd.f32 %v439_v27, %v438_v28  ;;  %v1483_v27 = vld [vmem:[#allocation3 + $0x60] sm:$0xff]  ;;  %v1476_v28 = vld [vmem:[#allocation3 + $0x28] sm:$0xff] }
  0xc2   :  { %705 = vmatpush.bf16.msrb.mxu2 %v1485_v16 }
  0xc3   :  { %v420_v19 = vpop.f32.mrf.mxu2  ;;  %v316_v25 = vpop.f32.mrf.mxu0 }
  0xc4   :  { %v2053_v23 = vadd.f32 %v420_v19, %v364_v18  ;;  %v365_v26 = vpop.f32.mrf.mxu1  ;;  %v1494_v18 = vld [vmem:[#allocation3 + $0xb8] sm:$0xff]  ;;  %v1484_v19 = vld [vmem:[#allocation3 + $0x68] sm:$0xff] }
  0xc5   :  { %v366_v31 = vadd.f32 %v365_v26, %v316_v25  ;;  %v1477_v25 = vld [vmem:[#allocation3 + $0x30] sm:$0xff] }
  0xc6   :  { %v440_v30 = vmul.f32 %v2053_v23, %v2053_v23  ;;  %v430_v34 = vadd.f32 %v429_v29, %v2053_v23  ;;  %706 = vmatpush.bf16.msrb.mxu2 %v1484_v19  ;;  %v1493_v26 = vld [vmem:[#allocation3 + $0xb0] sm:$0xff]  ;;  %v1492_v29 = vld [vmem:[#allocation3 + $0xa8] sm:$0xff]  ;;  %v573_v19 = vld [vmem:[#allocation8] sm:$0x1] }
  0xc8   :  { %v443_v36 = vadd.f32 %v442_v33, %v440_v30  ;;  %v1482_v30 = vld [vmem:[#allocation3 + $0x58] sm:$0xff]  ;;  %v1481_v33 = vld [vmem:[#allocation3 + $0x50] sm:$0xff] }
  0xca   :  { %707 = vmatpush.bf16.msrb.mxu2 %v1483_v27 }
  0xcb   :  { %v422_v32 = vpop.f32.mrf.mxu2 }
  0xcc   :  { %v2064_v35 = vadd.f32 %v422_v32, %v366_v31  ;;  %v1475_v31 = vld [vmem:[#allocation3 + $0x20] sm:$0xff] }
  0xcd   :  { %v1491_v32 = vld [vmem:[#allocation3 + $0xa0] sm:$0xff] }
  0xce   :  { %v431_v37 = vadd.f32 %v430_v34, %v2064_v35  ;;  %v441_v39 = vmul.f32 %v2064_v35, %v2064_v35  ;;  %708 = vmatpush.bf16.msrb.mxu2 %v1482_v30 }
  0xd0   :  { %v432_v41 = vrot.slane %v431_v37, 4  ;;  %v444_v42 = vadd.f32 %v443_v36, %v441_v39 }
  0xd2   :  { %v445_v43 = vrot.slane %v444_v42, 4  ;;  %v433_v44 = vadd.f32 %v432_v41, %v431_v37  ;;  %709 = vmatpush.bf16.msrb.mxu2 %v1481_v33  ;;  %v1474_v41 = vld [vmem:[#allocation3 + $0x18] sm:$0xff] }
  0xd4   :  { %v434_v45 = vrot.slane %v433_v44, 2  ;;  %v446_v46 = vadd.f32 %v445_v43, %v444_v42  ;;  %v1490_v42 = vld [vmem:[#allocation3 + $0x98] sm:$0xff]  ;;  %v1480_v43 = vld [vmem:[#allocation3 + $0x48] sm:$0xff] }
  0xd6   :  { %v435_v47 = vadd.f32 %v434_v45, %v433_v44  ;;  %v447_v48 = vrot.slane %v446_v46, 2  ;;  %710 = vmatpush.bf16.msrb.mxu2 %v1480_v43 }
  0xd8   :  { %v436_v49 = vrot.slane %v435_v47, 1  ;;  %v448_v50 = vadd.f32 %v447_v48, %v446_v46  ;;  %v1473_v46 = vld [vmem:[#allocation3 + $0x10] sm:$0xff]  ;;  %v1479_v48 = vld [vmem:[#allocation3 + $0x40] sm:$0xff] }
  0xda   :  { %v437_v59 = vadd.f32 %v436_v49, %v435_v47  ;;  %v449_v60 = vrot.slane %v448_v50, 1  ;;  %v1489_v47 = vld [vmem:[#allocation3 + $0x90] sm:$0xff]  ;;  %v1472_v49 = vld [vmem:[#allocation3 + $0x8] sm:$0xff]  ;;  %711 = vmatpush.bf16.msrb.mxu2 %v1479_v48 }
  0xdc   :  { %483 = vmatmul.f32.vlgmr.msra.gmra.mxu3 %v437_v59  ;;  %v450_v2 = vadd.f32 %v449_v60, %v448_v50  ;;  %v1488_v50 = vld [vmem:[#allocation3 + $0x88] sm:$0xff]  ;;  %v1471_v59 = vld [vmem:[#allocation3] sm:$0xff] }
  0xdd   :  { %771 = vmatpush.bf16.msra.mxu3 %v1478_v17  ;;  %v1487_v60 = vld [vmem:[#allocation3 + $0x80] sm:$0xff] }
  0xde   :  { %529 = vmatmul.f32.vlgmr.msrb.gmra.mxu0 %v450_v2  ;;  %955 = vmatpush.msra.mxu2 %v2044_v15 }
  0xdf   :  { %854 = vmatpush.bf16.msrb.mxu0 %v1494_v18 }
  0xe1   :  { %772 = vmatpush.bf16.msra.mxu3 %v1477_v25 }
  0xe3   :  { %855 = vmatpush.bf16.msrb.mxu0 %v1493_v26 }
  0xe5   :  { %773 = vmatpush.bf16.msra.mxu3 %v1476_v28 }
  0xe7   :  { %856 = vmatpush.bf16.msrb.mxu0 %v1492_v29 }
  0xe9   :  { %774 = vmatpush.bf16.msra.mxu3 %v1475_v31 }
  0xeb   :  { %857 = vmatpush.bf16.msrb.mxu0 %v1491_v32 }
  0xed   :  { %775 = vmatpush.bf16.msra.mxu3 %v1474_v41 }
  0xef   :  { %858 = vmatpush.bf16.msrb.mxu0 %v1490_v42 }
  0xf1   :  { %776 = vmatpush.bf16.msra.mxu3 %v1473_v46 }
  0xf3   :  { %859 = vmatpush.bf16.msrb.mxu0 %v1489_v47 }
  0xf5   :  { %777 = vmatpush.bf16.msra.mxu3 %v1472_v49 }
  0xf7   :  { %860 = vmatpush.bf16.msrb.mxu0 %v1488_v50 }
  0xf9   :  { %778 = vmatpush.bf16.msra.mxu3 %v1471_v59 }
  0xfb   :  { %861 = vmatpush.bf16.msrb.mxu0 %v1487_v60 }
 0x15b   :  { %v530_v3 = vpop.f32.mrf.mxu0 }
 0x15c   :  { %v533_v4 = vmul.f32 0.001953125, %v530_v3 }
 0x15e   :  { %1328 = vmatmul.msk.f32.vlgmr.msra.gmra.mxu0 %vm489_vm5, %v533_v4 }
 0x15f   :  { %v484_v10 = vpop.f32.mrf.mxu3  ;;  %1118 = vmatpush.msra.mxu0 %v1916_v51 }
 0x160   :  { %v487_v13 = vmul.f32 0.001953125, %v484_v10 }
 0x161   :  { %1119 = vmatpush.msra.mxu0 %v1923_v52 }
 0x162   :  { %1327 = vmatmul.msk.f32.vlgmr.msrb.gmra.mxu3 %vm489_vm5, %v487_v13 }
 0x163   :  { %960 = vmatpush.msrb.mxu3 %v1916_v51  ;;  %1120 = vmatpush.msra.mxu0 %v1931_v53 }
 0x165   :  { %961 = vmatpush.msrb.mxu3 %v1923_v52  ;;  %1121 = vmatpush.msra.mxu0 %v1939_v54 }
 0x167   :  { %962 = vmatpush.msrb.mxu3 %v1931_v53  ;;  %1122 = vmatpush.msra.mxu0 %v1947_v55 }
 0x169   :  { %963 = vmatpush.msrb.mxu3 %v1939_v54  ;;  %1123 = vmatpush.msra.mxu0 %v1955_v56 }
 0x16b   :  { %964 = vmatpush.msrb.mxu3 %v1947_v55  ;;  %1124 = vmatpush.msra.mxu0 %v1963_v57 }
 0x16d   :  { %965 = vmatpush.msrb.mxu3 %v1955_v56  ;;  %1125 = vmatpush.msra.mxu0 %v1971_v58 }
 0x16f   :  { %966 = vmatpush.msrb.mxu3 %v1963_v57  ;;  %1126 = vmatpush.msra.mxu0 %v1979_v61 }
 0x171   :  { %967 = vmatpush.msrb.mxu3 %v1971_v58  ;;  %1127 = vmatpush.msra.mxu0 %v1987_v62 }
 0x173   :  { %968 = vmatpush.msrb.mxu3 %v1979_v61  ;;  %1128 = vmatpush.msra.mxu0 %v1995_v63 }
 0x175   :  { %969 = vmatpush.msrb.mxu3 %v1987_v62  ;;  %1129 = vmatpush.msra.mxu0 %v2003_v0 }
 0x177   :  { %970 = vmatpush.msrb.mxu3 %v1995_v63  ;;  %1130 = vmatpush.msra.mxu0 %v2008_v1 }
 0x179   :  { %971 = vmatpush.msrb.mxu3 %v2003_v0  ;;  %1131 = vmatpush.msra.mxu0 %v2016_v5 }
 0x17b   :  { %972 = vmatpush.msrb.mxu3 %v2008_v1  ;;  %1132 = vmatpush.msra.mxu0 %v2024_v6 }
 0x17d   :  { %973 = vmatpush.msrb.mxu3 %v2016_v5  ;;  %1133 = vmatpush.msra.mxu0 %v2032_v7 }
 0x17f   :  { %974 = vmatpush.msrb.mxu3 %v2024_v6 }
 0x181   :  { %975 = vmatpush.msrb.mxu3 %v2032_v7 }
 0x1db   :  { %v554_v37 = vpop.f32.mrf.mxu0 }
 0x1e5   :  { %v510_v34 = vpop.f32.mrf.mxu3 }
 0x1e6   :  { %v557_v36 = vmul.f32 %v510_v34, %v510_v34 }
 0x1e8   :  { %v558_v39 = vsub.f32 %v554_v37, %v557_v36 }
 0x1ea   :  { %v559_v44 = vmax.f32 %v558_v39, 0.0 }
 0x1ec   :  { %v561_v45 = vadd.f32 1e-05, %v559_v44 }
 0x1ee   :  { %1512 = vrsqrt.f32 %v561_v45  ;;  %vm568_vm7 = vweird.f32 %v561_v45 }
 0x1f4   :  { %v1513_v2 = vpop.eup %1512 }
 0x1f5   :  { %v563_v3 = vmul.f32 %v1513_v2, %v561_v45  ;;  %vm569_vm6 = vweird.f32 %v1513_v2 }
 0x1f6   :  { %vm570_vm8 = vmor %vm568_vm7, %vm569_vm6 }
 0x1f7   :  { %v564_v4 = vmul.f32 %v1513_v2, %v563_v3 }
 0x1f9   :  { %v565_v10 = vmul.f32 0.5, %v564_v4 }
 0x1fb   :  { %v566_v13 = vsub.f32 1.5, %v565_v10 }
 0x1fd   :  { %v567_v16 = vmul.f32 %v1513_v2, %v566_v13 }
 0x1ff   :  { %v571_v17 = vsel %vm570_vm8, %v1513_v2, %v567_v16 }
 0x200   :  { %v572_v18 = vmul.f32 %v571_v17, %v560_v14  ;;  %v1498_v14 = vld [vmem:[#allocation6 + $0x18] sm:$0xff] }
 0x202   :  { %v574_v25 = vmul.f32 %v572_v18, %v510_v34  ;;  %v577_v26 = vperm.slane %v572_v18, 0 }
 0x204   :  { %v575_v27 = vsub.f32 %v573_v19, %v574_v25  ;;  %v579_v28 = vmul.f32 %v577_v26, %v2051_v22  ;;  %v580_v29 = vmul.f32 %v577_v26, %v2049_v21  ;;  %v581_v30 = vmul.f32 %v577_v26, %v2053_v23 }
 0x205   :  { %v582_v31 = vmul.f32 %v577_v26, %v2064_v35 }
 0x206   :  { %v584_v32 = vperm.slane %v575_v27, 0 }
 0x208   :  { %v586_v33 = vadd.f32 %v584_v32, %v579_v28  ;;  %v587_v34 = vadd.f32 %v584_v32, %v580_v29  ;;  %v588_v36 = vadd.f32 %v584_v32, %v581_v30  ;;  %v589_v37 = vadd.f32 %v584_v32, %v582_v31 }
 0x20a   :  { %v590_v22 = vmax.f32 %v586_v33, 0.0  ;;  %v591_v39 = vmax.f32 %v587_v34, 0.0  ;;  %v592_v21 = vmax.f32 %v588_v36, 0.0  ;;  %v593_v41 = vmax.f32 %v589_v37, 0.0 }
 0x20c   :  { %596 = vst [vmem:[#allocation2 + $0x18] sm:$0xff] %v592_v21  ;;  %v602_v23 = vpack.c.bf16 %v591_v39, %v590_v22  ;;  %v603_v46 = vpack.c.bf16 %v593_v41, %v592_v21 }
 0x20d   :  { %594 = vst [vmem:[#allocation2 + $0x8] sm:$0xff] %v590_v22 }
 0x20e   :  { %595 = vst [vmem:[#allocation2 + $0x10] sm:$0xff] %v591_v39  ;;  %712 = vmatmul.bf16.vlgmr.msrb.gmra.mxu2 %v602_v23 }
 0x20f   :  { %597 = vst [vmem:[#allocation2 + $0x20] sm:$0xff] %v593_v41  ;;  %1081 = vmatpush.bf16.msrb.mxu2 %v1498_v14 }
 0x214   :  { %v604_v35 = vld [vmem:[#allocation2 + $0x7] sm:$0xff] }
 0x215   :  { %v605_v42 = vld [vmem:[#allocation2 + $0xf] sm:$0xff]  ;;  %v606_v47 = vld [vmem:[#allocation2 + $0x17] sm:$0xff] }
 0x216   :  { %v614_v43 = vld [vmem:[#allocation2 + $0x9] sm:$0xff]  ;;  %v615_v44 = vld [vmem:[#allocation2 + $0x11] sm:$0xff]  ;;  %v1394_v45 = vpack.c.bf16 %v605_v42, %v604_v35  ;;  %v607_v48 = vld [vmem:[#allocation2 + $0x1f] sm:$0xff] }
 0x217   :  { %v1432_v20 = vpack.c.bf16 %v615_v44, %v614_v43  ;;  %v616_v49 = vld [vmem:[#allocation2 + $0x19] sm:$0xff]  ;;  %v617_v24 = vld [vmem:[#allocation2 + $0x21] sm:$0xff]  ;;  %v1397_v50 = vpack.c.bf16 %v607_v48, %v606_v47 }
 0x218   :  { %1395 = vmatmul.msk.bf16.vlgmr.msra.gmra.mxu3 %vm1393_vm10, %v1394_v45  ;;  %v1435_v59 = vpack.c.bf16 %v617_v24, %v616_v49 }
 0x219   :  { %1433 = vmatmul.msk.bf16.vlgmr.msrb.gmra.mxu0 %vm1431_vm11, %v1432_v20  ;;  %1201 = vmatpush.msra.mxu3 %v2044_v15 }
 0x21e   :  { %717 = vmatmul.bf16.gmra.mxu2 %v603_v46 }
 0x228   :  { %1398 = vmatmul.msk.bf16.gmra.mxu3 %vm1396_vm12, %v1397_v50 }
 0x229   :  { %1436 = vmatmul.msk.bf16.gmra.mxu0 %vm1434_vm13, %v1435_v59 }
 0x291   :  { %v713_v60 = vpop.f32.mrf.mxu2 }
 0x296   :  { %v863_v2 = vpop.f32.mrf.mxu0 }
 0x299   :  { %v715_v4 = vpop.f32.mrf.mxu2 }
 0x29b   :  { %v780_v3 = vpop.f32.mrf.mxu3 }
 0x29c   :  { %v781_v19 = vadd.f32 %v780_v3, %v713_v60  ;;  %v1497_v60 = vld [vmem:[#allocation6 + $0x10] sm:$0xff]  ;;  %v1495_v3 = vld [vmem:[#allocation6] sm:$0xff] }
 0x29d   :  { %1082 = vmatpush.bf16.msrb.mxu2 %v1497_v60 }
 0x29e   :  { %v865_v10 = vpop.f32.mrf.mxu0  ;;  %v2126_v26 = vadd.f32 %v863_v2, %v781_v19  ;;  %v1496_v2 = vld [vmem:[#allocation6 + $0x8] sm:$0xff] }
 0x2a0   :  { %v886_v31 = vmul.f32 %v2126_v26, %v2126_v26 }
 0x2a1   :  { %v718_v16 = vpop.f32.mrf.mxu2  ;;  %1083 = vmatpush.bf16.msrb.mxu2 %v1496_v2 }
 0x2a3   :  { %v782_v13 = vpop.f32.mrf.mxu3 }
 0x2a4   :  { %v783_v17 = vadd.f32 %v782_v13, %v715_v4  ;;  %v1037_v13 = vpack.c.bf16 %v1845_v9, %v1840_v8  ;;  %v1038_v8 = vpack.c.bf16 %v1857_v12, %v1850_v11 }
 0x2a5   :  { %1084 = vmatpush.bf16.msrb.mxu2 %v1495_v3 }
 0x2a6   :  { %v868_v38 = vpop.f32.mrf.mxu0  ;;  %v2124_v40 = vadd.f32 %v865_v10, %v783_v17 }
 0x2a8   :  { %v887_v28 = vmul.f32 %v2124_v40, %v2124_v40  ;;  %v877_v32 = vadd.f32 %v2124_v40, %v2126_v26 }
 0x2a9   :  { %v720_v29 = vpop.f32.mrf.mxu2 }
 0x2aa   :  { %v890_v37 = vadd.f32 %v887_v28, %v886_v31 }
 0x2ab   :  { %v785_v18 = vpop.f32.mrf.mxu3 }
 0x2ac   :  { %v786_v25 = vadd.f32 %v785_v18, %v718_v16 }
 0x2ae   :  { %v2128_v27 = vadd.f32 %v868_v38, %v786_v25  ;;  %v870_v36 = vpop.f32.mrf.mxu0 }
 0x2b0   :  { %v888_v33 = vmul.f32 %v2128_v27, %v2128_v27  ;;  %v878_v22 = vadd.f32 %v877_v32, %v2128_v27 }
 0x2b2   :  { %v891_v21 = vadd.f32 %v890_v37, %v888_v33 }
 0x2b3   :  { %v787_v30 = vpop.f32.mrf.mxu3 }
 0x2b4   :  { %v788_v34 = vadd.f32 %v787_v30, %v720_v29 }
 0x2b6   :  { %v2139_v39 = vadd.f32 %v870_v36, %v788_v34 }
 0x2b8   :  { %v879_v41 = vadd.f32 %v878_v22, %v2139_v39  ;;  %v889_v23 = vmul.f32 %v2139_v39, %v2139_v39 }
 0x2ba   :  { %v880_v35 = vrot.slane %v879_v41, 4  ;;  %v892_v42 = vadd.f32 %v891_v21, %v889_v23 }
 0x2bc   :  { %v893_v43 = vrot.slane %v892_v42, 4  ;;  %v881_v44 = vadd.f32 %v880_v35, %v879_v41 }
 0x2be   :  { %v894_v45 = vadd.f32 %v893_v43, %v892_v42  ;;  %v882_v20 = vrot.slane %v881_v44, 2 }
 0x2c0   :  { %v883_v46 = vadd.f32 %v882_v20, %v881_v44  ;;  %v895_v47 = vrot.slane %v894_v45, 2 }
 0x2c2   :  { %v884_v48 = vrot.slane %v883_v46, 1  ;;  %v896_v49 = vadd.f32 %v895_v47, %v894_v45 }
 0x2c4   :  { %v885_v24 = vadd.f32 %v884_v48, %v883_v46  ;;  %v897_v50 = vrot.slane %v896_v49, 1 }
 0x2c6   :  { %931 = vmatmul.f32.vlgmr.msrb.gmra.mxu1 %v885_v24  ;;  %v898_v59 = vadd.f32 %v897_v50, %v896_v49  ;;  %v1007_v50 = vld [vmem:[#allocation9] sm:$0x1] }
 0x2c7   :  { %1157 = vmatpush.msrb.mxu1 %v2044_v15 }
 0x2c8   :  { %976 = vmatmul.f32.vlgmr.msrb.gmra.mxu3 %v898_v59 }
 0x343   :  { %v932_v4 = vpop.f32.mrf.mxu1 }
 0x344   :  { %v935_v10 = vmul.f32 0.001953125, %v932_v4 }
 0x346   :  { %1437 = vmatmul.msk.f32.vlgmr.msra.gmra.mxu2 %vm489_vm5, %v935_v10 }
 0x34b   :  { %v977_v14 = vpop.f32.mrf.mxu3 }
 0x34c   :  { %v980_v16 = vmul.f32 0.001953125, %v977_v14  ;;  %v1020_v14 = vld [vmem:[#allocation11] sm:$0x1] }
 0x34e   :  { %1438 = vmatmul.msk.f32.vlgmr.msra.gmra.mxu1 %vm489_vm5, %v980_v16  ;;  %1455 = vmatmul.msk.bf16.vlgmr.msrb.gmra.mxu2 %vm207_vm0, %v1037_v13  ;;  %v1209_v16 = vld [vmem:[#allocation12] sm:$0x1] }
 0x34f   :  { %1162 = vmatpush.msra.mxu1 %v1916_v51 }
 0x351   :  { %1163 = vmatpush.msra.mxu1 %v1923_v52 }
 0x353   :  { %1164 = vmatpush.msra.mxu1 %v1931_v53 }
 0x355   :  { %1165 = vmatpush.msra.mxu1 %v1939_v54 }
 0x357   :  { %1166 = vmatpush.msra.mxu1 %v1947_v55 }
 0x359   :  { %1167 = vmatpush.msra.mxu1 %v1955_v56 }
 0x35b   :  { %1168 = vmatpush.msra.mxu1 %v1963_v57 }
 0x35d   :  { %1169 = vmatpush.msra.mxu1 %v1971_v58 }
 0x35e   :  { %1456 = vmatmul.msk.bf16.gmra.mxu2 %vm207_vm0, %v1038_v8 }
 0x35f   :  { %1170 = vmatpush.msra.mxu1 %v1979_v61 }
 0x361   :  { %1171 = vmatpush.msra.mxu1 %v1987_v62 }
 0x363   :  { %1172 = vmatpush.msra.mxu1 %v1995_v63 }
 0x365   :  { %1173 = vmatpush.msra.mxu1 %v2003_v0 }
 0x367   :  { %1174 = vmatpush.msra.mxu1 %v2008_v1 }
 0x369   :  { %1175 = vmatpush.msra.mxu1 %v2016_v5 }
 0x36b   :  { %1176 = vmatpush.msra.mxu1 %v2024_v6 }
 0x36d   :  { %1177 = vmatpush.msra.mxu1 %v2032_v7 }
 0x3c9   :  { %v2169_v9 = vpop.f32.mrf.mxu2 }
 0x3ca   :  { %v1004_v37 = vmul.f32 %v2169_v9, %v2169_v9 }
 0x3cb   :  { %v1001_v32 = vpop.f32.mrf.mxu1 }
 0x3cc   :  { %v1005_v22 = vsub.f32 %v1001_v32, %v1004_v37 }
 0x3ce   :  { %v1006_v21 = vmax.f32 %v1005_v22, 0.0 }
 0x3d0   :  { %v1008_v41 = vadd.f32 1e-05, %v1006_v21 }
 0x3d1   :  { %v2171_v11 = vpop.f32.mrf.mxu2 }
 0x3d2   :  { %v1105_v1 = vmul.f32 %v2171_v11, %v2171_v11  ;;  %1514 = vrsqrt.f32 %v1008_v41  ;;  %vm1015_vm15 = vweird.f32 %v1008_v41 }
 0x3d8   :  { %v1515_v23 = vpop.eup %1514 }
 0x3d9   :  { %v2173_v12 = vpop.f32.mrf.mxu2  ;;  %v1010_v35 = vmul.f32 %v1515_v23, %v1008_v41  ;;  %vm1016_vm14 = vweird.f32 %v1515_v23 }
 0x3da   :  { %v1096_v52 = vadd.f32 %v2173_v12, %v2171_v11  ;;  %v1106_v0 = vmul.f32 %v2173_v12, %v2173_v12  ;;  %vm1017_vm0 = vmor %vm1015_vm15, %vm1016_vm14 }
 0x3db   :  { %v1011_v42 = vmul.f32 %v1515_v23, %v1010_v35 }
 0x3dc   :  { %v1109_v6 = vadd.f32 %v1106_v0, %v1105_v1 }
 0x3dd   :  { %v1012_v45 = vmul.f32 0.5, %v1011_v42 }
 0x3df   :  { %v1013_v47 = vsub.f32 1.5, %v1012_v45 }
 0x3e1   :  { %v2175_v51 = vpop.f32.mrf.mxu2  ;;  %v1014_v49 = vmul.f32 %v1515_v23, %v1013_v47 }
 0x3e2   :  { %v1097_v53 = vadd.f32 %v1096_v52, %v2175_v51  ;;  %v1107_v5 = vmul.f32 %v2175_v51, %v2175_v51 }
 0x3e3   :  { %v1018_v59 = vsel %vm1017_vm0, %v1515_v23, %v1014_v49 }
 0x3e4   :  { %v1110_v15 = vadd.f32 %v1109_v6, %v1107_v5  ;;  %v1019_v2 = vmul.f32 %v1018_v59, %v1007_v50 }
 0x3e6   :  { %v1021_v10 = vmul.f32 %v1019_v2, %v2169_v9 }
 0x3e8   :  { %v1022_v52 = vsub.f32 %v1020_v14, %v1021_v10 }
 0x3e9   :  { %v2180_v54 = vpop.f32.mrf.mxu2 }
 0x3ea   :  { %v1098_v55 = vadd.f32 %v1097_v53, %v2180_v54  ;;  %v1108_v7 = vmul.f32 %v2180_v54, %v2180_v54 }
 0x3ec   :  { %v1099_v56 = vrot.slane %v1098_v55, 4  ;;  %v1111_v17 = vadd.f32 %v1110_v15, %v1108_v7 }
 0x3ee   :  { %v1100_v57 = vadd.f32 %v1099_v56, %v1098_v55  ;;  %v1112_v38 = vrot.slane %v1111_v17, 4  ;;  %v1024_v55 = vperm.slane %v1019_v2, 0 }
 0x3f0   :  { %v1101_v58 = vrot.slane %v1100_v57, 2  ;;  %v1113_v18 = vadd.f32 %v1112_v38, %v1111_v17  ;;  %v1027_v9 = vmul.f32 %v1024_v55, %v2124_v40  ;;  %v1028_v1 = vmul.f32 %v1024_v55, %v2128_v27 }
 0x3f1   :  { %v1029_v5 = vmul.f32 %v1024_v55, %v2139_v39 }
 0x3f2   :  { %v1102_v61 = vadd.f32 %v1101_v58, %v1100_v57  ;;  %v1114_v19 = vrot.slane %v1113_v18, 2  ;;  %v1222_v57 = vld [vmem:[#allocation14] sm:$0x1] }
 0x3f4   :  { %v1103_v62 = vrot.slane %v1102_v61, 1  ;;  %v1115_v28 = vadd.f32 %v1114_v19, %v1113_v18 }
 0x3f6   :  { %v1104_v63 = vadd.f32 %v1103_v62, %v1102_v61  ;;  %v1116_v30 = vrot.slane %v1115_v28, 1  ;;  %v1031_v62 = vperm.slane %v1022_v52, 0 }
 0x3f8   :  { %1134 = vmatmul.f32.vlgmr.msra.gmra.mxu0 %v1104_v63  ;;  %v1117_v31 = vadd.f32 %v1116_v30, %v1115_v28  ;;  %v1026_v63 = vmul.f32 %v1024_v55, %v2126_v26  ;;  %v1034_v19 = vadd.f32 %v1031_v62, %v1027_v9  ;;  %v1036_v26 = vadd.f32 %v1031_v62, %v1029_v5 }
 0x3fa   :  { %v1033_v18 = vadd.f32 %v1031_v62, %v1026_v63 }
 0x475   :  { %v1135_v25 = vpop.f32.mrf.mxu0 }
 0x476   :  { %v1138_v29 = vmul.f32 0.001953125, %v1135_v25  ;;  %v1035_v25 = vadd.f32 %v1031_v62, %v1028_v1 }
 0x478   :  { %1457 = vmatmul.msk.f32.vlgmr.msrb.gmra.mxu1 %vm489_vm5, %v1138_v29 }
 0x480   :  { %1178 = vmatmul.f32.vlgmr.msra.gmra.mxu1 %v1117_v31 }
 0x4f5   :  { %v1159_v33 = vpop.f32.mrf.mxu1 }
 0x4f6   :  { %v1206_v43 = vmul.f32 %v1159_v33, %v1159_v33 }
 0x4fd   :  { %v1179_v34 = vpop.f32.mrf.mxu1 }
 0x4fe   :  { %v1182_v36 = vmul.f32 0.001953125, %v1179_v34 }
 0x500   :  { %1458 = vmatmul.msk.f32.vlgmr.msra.gmra.mxu3 %vm489_vm5, %v1182_v36 }
 0x583   :  { %v1203_v44 = vpop.f32.mrf.mxu3 }
 0x584   :  { %v1207_v20 = vsub.f32 %v1203_v44, %v1206_v43 }
 0x586   :  { %v1208_v46 = vmax.f32 %v1207_v20, 0.0 }
 0x588   :  { %v1210_v48 = vadd.f32 1e-05, %v1208_v46 }
 0x58a   :  { %1516 = vrsqrt.f32 %v1210_v48  ;;  %vm1217_vm2 = vweird.f32 %v1210_v48 }
 0x590   :  { %v1517_v24 = vpop.eup %1516 }
 0x591   :  { %v1212_v60 = vmul.f32 %v1517_v24, %v1210_v48  ;;  %vm1218_vm1 = vweird.f32 %v1517_v24 }
 0x592   :  { %vm1219_vm3 = vmor %vm1217_vm2, %vm1218_vm1 }
 0x593   :  { %v1213_v3 = vmul.f32 %v1517_v24, %v1212_v60 }
 0x595   :  { %v1214_v4 = vmul.f32 0.5, %v1213_v3 }
 0x597   :  { %v1215_v13 = vsub.f32 1.5, %v1214_v4 }
 0x599   :  { %v1216_v8 = vmul.f32 %v1517_v24, %v1215_v13 }
 0x59b   :  { %v1220_v53 = vsel %vm1219_vm3, %v1517_v24, %v1216_v8 }
 0x59c   :  { %v1221_v56 = vmul.f32 %v1220_v53, %v1209_v16 }
 0x59e   :  { %v1223_v58 = vmul.f32 %v1221_v56, %v1159_v33  ;;  %v1226_v61 = vperm.slane %v1221_v56, 0 }
 0x5a0   :  { %v1224_v0 = vsub.f32 %v1222_v57, %v1223_v58  ;;  %v1228_v6 = vmul.f32 %v1226_v61, %v2171_v11  ;;  %v1229_v7 = vmul.f32 %v1226_v61, %v2173_v12  ;;  %v1230_v15 = vmul.f32 %v1226_v61, %v2175_v51 }
 0x5a1   :  { %v1231_v17 = vmul.f32 %v1226_v61, %v2180_v54 }
 0x5a2   :  { %v1233_v38 = vperm.slane %v1224_v0, 0 }
 0x5a4   :  { %v1235_v28 = vadd.f32 %v1233_v38, %v1228_v6  ;;  %v1236_v29 = vadd.f32 %v1233_v38, %v1229_v7  ;;  %v1237_v40 = vadd.f32 %v1233_v38, %v1230_v15  ;;  %v1238_v30 = vadd.f32 %v1233_v38, %v1231_v17 }
 0x5a6   :  { %v1239_v27 = vadd.f32 %v1235_v28, %v1033_v18  ;;  %v1240_v31 = vadd.f32 %v1236_v29, %v1034_v19  ;;  %v1241_v39 = vadd.f32 %v1237_v40, %v1035_v25  ;;  %v1242_v32 = vadd.f32 %v1238_v30, %v1036_v26 }
 0x5a8   :  { %v1243_v11 = vmax.f32 %v1239_v27, 0.0  ;;  %v1244_v12 = vmax.f32 %v1240_v31, 0.0  ;;  %v1245_v51 = vmax.f32 %v1241_v39, 0.0  ;;  %v1246_v54 = vmax.f32 %v1242_v32, 0.0 }
 0x5aa   :  { %1247 = vst [vmem:[#allocation15] sm:$0xff] %v1243_v11 }
 0x5ab   :  { %1248 = vst [vmem:[#allocation15 + $0x8] sm:$0xff] %v1244_v12 }
 0x5ac   :  { %1249 = vst [vmem:[#allocation15 + $0x10] sm:$0xff] %v1245_v51 }
 0x5ad   :  { %1250 = vst [vmem:[#allocation15 + $0x18] sm:$0xff] %v1246_v54 }
 0x5ae   :  { %1263 = dma.vmem_to_hbm [thread:$0]  %s1256_s25, 512, %s1258_s27, [#allocation5], %s1731_s28, %s1731_s28, %s1732_s2  }
 0x5af   :  { %1718 = dma.done.wait [#allocation5], 512  }
 0x5b0   :  { %1719 = vsyncadd [#allocation5], 4294966784 }
 0x5b1   :  { %1268 = vsyncpa [#allocation4], 1 }
 0x5b2   :  { %1269 = vsyncpa [#allocation7], 1 }
 0x5b3   :  { %1270 = vsyncpa [#allocation10], 1 }
 0x5b4   :  { %1271 = vsyncpa [#allocation13], 1 }
 0x5b5   :  { %1272 = vsyncpa [#allocation5], 1 }

</bundles_post_ra>
